<compile_context>
chip_gen: v5e
topology: v5e:2x2
jax: 0.10.0
libtpu: 0.0.40
codegen_flags: <defaults>
</compile_context>

<pallas_src>
import functools

import jax
import jax.numpy as jnp
from jax.experimental import pallas as pl
from jax.experimental.pallas import tpu as pltpu


def _pad_channels_kernel(x_ref, o_ref, *, pad_lanes, data_lanes):
    """x_ref: (bb, C*HW)  ->  o_ref: (bb, (C + 2*pad)*HW), flattened per image.

    The channel zero-pad is a contiguous [zeros | data | zeros] layout in the
    flattened per-image vector, so it is a pure lane-dense copy + zero fill.
    """
    x = x_ref[...].astype(o_ref.dtype)
    bb = x.shape[0]
    if pad_lanes == 0:
        o_ref[...] = x
    elif pad_lanes % 128 == 0 and data_lanes % 128 == 0:
        # Static, 128-aligned lane offsets -> three dense region stores, no
        # full-width VMEM temporary from a concat.
        z = jnp.zeros((bb, pad_lanes), dtype=o_ref.dtype)
        o_ref[:, :pad_lanes] = z
        o_ref[:, pad_lanes:pad_lanes + data_lanes] = x
        o_ref[:, pad_lanes + data_lanes:] = z
    else:
        # Unaligned offsets would turn the region stores into cross-lane
        # relayouts + masked stores; build the tile once and store it whole.
        z = jnp.zeros((bb, pad_lanes), dtype=o_ref.dtype)
        o_ref[...] = jnp.concatenate([z, x, z], axis=-1)


def _sublane_multiple(itemsize):
    # f32 -> 8 rows per vreg sublane group, bf16 -> 16, int8/fp8 -> 32.
    return max(8, 32 // max(int(itemsize), 1))


def _num_tensorcores():
    """Best-effort: 2 for chips with two TensorCores sharing a grid, else 1."""
    try:
        kind = jax.devices()[0].device_kind.lower()
    except Exception:
        return 1
    return 2 if any(k in kind for k in ("v7", "v4", "v5p")) else 1


def _pick_batch_block(n, bytes_per_img, itemsize,
                      target_bytes=12 << 20, num_cores=1):
    """Largest sublane-aligned per-step batch block:
       (a) ~target_bytes of in+out data per grid step,
       (b) multiple of the sublane packing factor (or == n for tiny batches),
       (c) optionally >= num_cores grid steps so both TensorCores get work."""
    sub = _sublane_multiple(itemsize)
    if n <= sub:
        return n  # full array dim -> legal block, avoids any masking
    bb = max(1, target_bytes // max(bytes_per_img, 1))
    bb = min(bb, n)
    if num_cores >= 2:
        # Only worth halving the block if the grid is actually sharded across
        # TensorCores (dimension_semantics=("parallel",)).
        bb = min(bb, max(sub, -(-n // num_cores)))
    bb = max(sub, (bb // sub) * sub)  # sublane-aligned, never 1..sub-1
    return bb


def lambda_layer(x, planes, *, force_pallas=False, min_pallas_bytes=256 * 1024):
    """Pallas implementation of LambdaLayer (option-A shortcut) for NCHW x."""
    n, c, h, w = x.shape
    pad = planes // 4
    c_out = c + 2 * pad
    # ceil(H/2), ceil(W/2): matches PyTorch x[:, :, ::2, ::2] for odd sizes.
    h_out, w_out = -(-h // 2), -(-w // 2)
    hw = h_out * w_out
    itemsize = x.dtype.itemsize

    if not force_pallas and n * c_out * hw * itemsize < min_pallas_bytes:
        # Small-tensor bypass: fixed launch + per-step overhead would dominate
        # a sub-microsecond roofline copy.
        return lambda_layer_ref(x, planes)

    # Stride-2 spatial downsample in the wrapper (XLA fuses slice+reshape into
    # one copy), then flatten per image so the kernel's last dim is lane-dense.
    x_flat = x[:, :, ::2, ::2].reshape(n, c * hw)

    bytes_per_img = (c + c_out) * hw * itemsize  # in + out traffic per image
    bb = _pick_batch_block(n, bytes_per_img, itemsize,
                           num_cores=_num_tensorcores())
    grid = (pl.cdiv(n, bb),)

    in_block_bytes = bb * c * hw * itemsize
    out_block_bytes = bb * c_out * hw * itemsize
    # Double-buffered in + out blocks, plus headroom; capped well inside the
    # smallest physical VMEM (v7x: 64 MiB).
    vmem_limit = int(min(max(2 * (in_block_bytes + out_block_bytes) + (4 << 20),
                             16 << 20),
                         48 << 20))

    kernel = functools.partial(_pad_channels_kernel,
                               pad_lanes=pad * hw, data_lanes=c * hw)

    out_flat = pl.pallas_call(
        kernel,
        out_shape=jax.ShapeDtypeStruct((n, c_out * hw), x.dtype),
        grid=grid,
        in_specs=[pl.BlockSpec((bb, c * hw), lambda i: (i, 0))],
        out_specs=pl.BlockSpec((bb, c_out * hw), lambda i: (i, 0)),
        compiler_params=pltpu.CompilerParams(
            dimension_semantics=("parallel",),
            vmem_limit_bytes=vmem_limit),
    )(x_flat)

    return out_flat.reshape(n, c_out, h_out, w_out)


def lambda_layer_ref(x, planes):
    """Plain-JAX reference (mirrors the PyTorch lambda exactly)."""
    pad = planes // 4
    down = x[:, :, ::2, ::2]
    return jnp.pad(down, ((0, 0), (pad, pad), (0, 0), (0, 0)))


if __name__ == "__main__":
    key = jax.random.PRNGKey(0)
    # Small shapes consistent with the CIFAR-ResNet usage of LambdaLayer:
    # batch=2, in-channels=4, spatial=16x16; block "planes"=8 -> pad 2/side.
    N, C, H, W = 2, 4, 16, 16
    PLANES = 8

    x = jax.random.normal(key, (N, C, H, W), dtype=jnp.float32)

    # Force the Pallas path so the kernel itself is exercised at demo scale.
    out = lambda_layer(x, PLANES, force_pallas=True)
    out = jax.block_until_ready(out)

    ref = lambda_layer_ref(x, PLANES)
    assert out.shape == (N, C + 2 * (PLANES // 4), H // 2, W // 2), out.shape
    assert jnp.array_equal(out, ref), "mismatch vs reference"

    # Also check the small-tensor bypass path gives identical results.
    out_bypass = jax.block_until_ready(lambda_layer(x, PLANES))
    assert jnp.array_equal(out_bypass, ref), "bypass mismatch vs reference"

    print("KERNEL_OK")
</pallas_src>

<mosaic_0001>
module attributes {stable_mosaic.version = 11 : i64} {
  func.func @_pad_channels_kernel(%arg0: i32, %arg1: memref<2x256xf32, #tpu.memory_space<vmem>>, %arg2: memref<2x512xf32, #tpu.memory_space<vmem>>) attributes {dimension_semantics = [#tpu.dimension_semantics<parallel>], iteration_bounds = array<i64: 1>, scalar_prefetch = 0 : i64, scratch_operands = 0 : i64, tpu.core_type = #tpu.core_type<tc>, window_params = [{transform_indices = @transform_0, window_bounds = array<i64: 2, 256>}, {transform_indices = @transform_1, window_bounds = array<i64: 2, 512>}]} {
    %c0 = arith.constant 0 : index
    %c0_0 = arith.constant 0 : index
    %0 = vector.load %arg1[%c0, %c0_0] : memref<2x256xf32, #tpu.memory_space<vmem>>, vector<2x256xf32>
    %cst = arith.constant 0.000000e+00 : f32
    %1 = vector.broadcast %cst : f32 to vector<2x128xf32>
    %c0_1 = arith.constant 0 : index
    %c0_2 = arith.constant 0 : index
    %2 = vector.load %arg2[%c0_1, %c0_2] : memref<2x512xf32, #tpu.memory_space<vmem>>, vector<2x128xf32>
    tpu.vector_store %arg2[%c0_1, %c0_2], %1 {strides = array<i32>} : memref<2x512xf32, #tpu.memory_space<vmem>>, vector<2x128xf32>,
    %c0_3 = arith.constant 0 : index
    %c128 = arith.constant 128 : index
    %3 = vector.load %arg2[%c0_3, %c128] : memref<2x512xf32, #tpu.memory_space<vmem>>, vector<2x256xf32>
    tpu.vector_store %arg2[%c0_3, %c128], %0 {strides = array<i32>} : memref<2x512xf32, #tpu.memory_space<vmem>>, vector<2x256xf32>,
    %c0_4 = arith.constant 0 : index
    %c384 = arith.constant 384 : index
    %4 = vector.load %arg2[%c0_4, %c384] : memref<2x512xf32, #tpu.memory_space<vmem>>, vector<2x128xf32>
    tpu.vector_store %arg2[%c0_4, %c384], %1 {strides = array<i32>} : memref<2x512xf32, #tpu.memory_space<vmem>>, vector<2x128xf32>,
    return
  }
  func.func @transform_0(%arg0: i32) -> (i32, i32) {
    %c0_i32 = arith.constant 0 : i32
    %c0_i32_0 = arith.constant 0 : i32
    return %arg0, %c0_i32 : i32, i32
  }
  func.func @transform_1(%arg0: i32) -> (i32, i32) {
    %c0_i32 = arith.constant 0 : i32
    %c0_i32_0 = arith.constant 0 : i32
    return %arg0, %c0_i32 : i32, i32
  }
}

</mosaic_0001>

<bundles_post_ra>
// kernel: tpu_custom_call.1
= control target key start
LH: loop header
LB: loop body
LE: loop exit
PB: predicated region body
PF: predicated region fallthrough
CT: control target
= control target key end

     0   :  { %6 = vsyncpa [#allocation3], 0  ;;  %s118_s0 = inlined_call_operand.hbm [shape: f32[2,256], index: 0, kind: input, shape index: {}]   ;;  %s119_s1 = inlined_call_operand.hbm [shape: f32[2,512], index: 1, kind: output, shape index: {}]  }
   0x1   :  { %7 = vsyncpa [#allocation4], 0  ;;  %s13_s8 = sshll.u32 %s118_s0, 4  ;;  %s99_s9 = smov [#allocation2]   ;;  %s14_s8 = int_to_ptr.hbm [resolvable:$true] %s13_s8 }
   0x2   :  { %s15_s10 = sshll.u32 %s99_s9, 4  ;;  %s16_s10 = int_to_ptr.vmem [resolvable:$true] %s15_s10 }
   0x3   :  { %18 = dma.hbm_to_vmem [thread:$0]  %s14_s8, 64, %s16_s10, [#allocation3]  }
   0x4   :  { %95 = dma.done.wait [#allocation3], 64  }
   0x5   :  { %96 = vsyncadd [#allocation3], 4294967232  ;;  %v100_v0 = vmov 0.0   ;;  %s101_s11 = smov [#allocation5]   ;;  %s34_s15 = sshll.u32 %s119_s1, 4  ;;  %s35_s15 = int_to_ptr.hbm [resolvable:$true] %s34_s15 }
   0x6   :  { %24 = vst [vmem:[#allocation5] sm:$0x3] %v100_v0  ;;  %s32_s12 = sshll.u32 %s101_s11, 4  ;;  %v23_v1 = vld [vmem:[#allocation2] sm:$0xf]  ;;  %s33_s12 = int_to_ptr.vmem [resolvable:$true] %s32_s12 }
   0x7   :  { %26 = vst [vmem:[#allocation5 + $0x6] sm:$0x3] %v100_v0 }
   0x8   :  { %25 = vst [vmem:[#allocation5 + $0x2] sm:$0xf] %v23_v1 }
   0x9   :  { %37 = dma.vmem_to_hbm [thread:$0]  %s33_s12, 128, %s35_s15, [#allocation4]  }
   0xa   :  { %97 = dma.done.wait [#allocation4], 128  }
   0xb   :  { %98 = vsyncadd [#allocation4], 4294967168 }
   0xc   :  { %42 = vsyncpa [#allocation3], 1 }
   0xd   :  { %43 = vsyncpa [#allocation4], 1 }

</bundles_post_ra>
